<compile_context>
chip_gen: v7x
topology: tpu7x:2x2x1
jax: 0.10.0
libtpu: 0.0.40
codegen_flags: <defaults>
</compile_context>

<pallas_src>
import functools

import jax
import jax.numpy as jnp
from jax import lax
from jax.experimental import pallas as pl
from jax.experimental.pallas import tpu as pltpu


# ----------------------------------------------------------------------------
# Generation-aware VMEM budget.
# ----------------------------------------------------------------------------
def _vmem_budget_bytes():
    """Scoped-VMEM budget we are willing to request on this chip generation."""
    cap = 128 << 20
    try:
        cap = int(pltpu.get_tpu_info().vmem_capacity_bytes)
    except Exception:
        pass  # interpret mode / older API: assume 128 MiB-class chip
    if cap <= (64 << 20):
        # v7x-class (64 MiB physical): never request everything; leave headroom
        # for weights, temps and compiler-internal scratch.
        return max(min(cap - (12 << 20), 52 << 20), 32 << 20)
    # v5e / v6e (128 MiB physical): default scoped limit is only 16/32 MiB, so
    # the explicit override matters; still keep ~24 MiB headroom.
    return max(min(cap - (24 << 20), 104 << 20), 32 << 20)


def _pick_tile(hw, c, itemsize, per_buffer_bytes):
    """Largest multiple of 128 lanes whose (C, tile) slab fits per_buffer_bytes."""
    hw_pad = pl.cdiv(hw, 128) * 128
    tile = (per_buffer_bytes // (c * itemsize)) // 128 * 128
    return int(min(max(tile, 128), hw_pad))


# ----------------------------------------------------------------------------
# Shared excite block: two fused 1x1-conv matvecs on [avg | max] packed (C, 2).
# ----------------------------------------------------------------------------
def _excite_fused(pooled_f32, w1_ref, b1_ref, w2_ref, b2_ref):
    """pooled_f32: (C, 2) f32 = [avg | max]. Returns sigmoid(e_avg + e_max) (C, 1) f32."""
    w1 = w1_ref[...].astype(jnp.float32)            # (Cr, C)
    b1 = b1_ref[...].astype(jnp.float32)            # (Cr, 1)
    w2 = w2_ref[...].astype(jnp.float32)            # (C, Cr)
    b2 = b2_ref[...].astype(jnp.float32)            # (C, 1)
    h = jnp.dot(w1, pooled_f32, preferred_element_type=jnp.float32) + b1   # (Cr, 2)
    h = jnp.maximum(h, 0.0)                                                # ReLU
    e = jnp.dot(w2, h, preferred_element_type=jnp.float32) + b2            # (C, 2)
    return jax.nn.sigmoid(e[:, 0:1] + e[:, 1:2])                           # (C, 1)


# ----------------------------------------------------------------------------
# Strategy 1: single-pass (whole (C, HW) slab per batch; x read once).
# ----------------------------------------------------------------------------
def _ca_single_pass_kernel(inv_hw, x_ref, w1_ref, b1_ref, w2_ref, b2_ref, out_ref):
    x = x_ref[0]                                                          # (C, HW) native dtype
    # f32-accumulated average pool; max pool stays in the native dtype.
    s = jnp.sum(x, axis=-1, keepdims=True, dtype=jnp.float32)             # (C, 1) f32
    mx = jnp.max(x, axis=-1, keepdims=True).astype(jnp.float32)           # (C, 1) f32
    pooled = jnp.concatenate([s * inv_hw, mx], axis=-1)                   # (C, 2) f32
    att = _excite_fused(pooled, w1_ref, b1_ref, w2_ref, b2_ref)           # (C, 1) f32
    # Cast attention down once; multiply/stream in the input dtype.
    out_ref[0] = (att.astype(x.dtype) * x).astype(out_ref.dtype)


def _channel_attention_single_pass(x_flat, w1, b1_2d, w2, b2_2d, *, budget, donate_x):
    B, C, HW = x_flat.shape
    Cr = w1.shape[0]
    slab_bytes = C * HW * x_flat.dtype.itemsize
    # 2x double-buffered input + 2x output + temps/weights headroom.
    vmem_limit = int(min(budget, max(4 * slab_bytes + (2 << 20), 32 << 20)))

    kernel = functools.partial(_ca_single_pass_kernel, 1.0 / HW)
    return pl.pallas_call(
        kernel,
        out_shape=jax.ShapeDtypeStruct((B, C, HW), x_flat.dtype),
        grid_spec=pltpu.PrefetchScalarGridSpec(
            num_scalar_prefetch=0,
            grid=(B,),
            in_specs=[
                pl.BlockSpec((1, C, HW), lambda b: (b, 0, 0)),   # x slab per batch
                pl.BlockSpec((Cr, C), lambda b: (0, 0)),         # W1
                pl.BlockSpec((Cr, 1), lambda b: (0, 0)),         # b1
                pl.BlockSpec((C, Cr), lambda b: (0, 0)),         # W2
                pl.BlockSpec((C, 1), lambda b: (0, 0)),          # b2
            ],
            out_specs=pl.BlockSpec((1, C, HW), lambda b: (b, 0, 0)),
        ),
        compiler_params=pltpu.CompilerParams(
            dimension_semantics=("parallel",),
            vmem_limit_bytes=vmem_limit,
        ),
        input_output_aliases=({0: 0} if donate_x else {}),
    )(x_flat, w1, b1_2d, w2, b2_2d)


# ----------------------------------------------------------------------------
# Strategy 2: tiled two-pass (HW axis tiled; for slabs that do not fit VMEM).
# ----------------------------------------------------------------------------
def _ca_pool_excite_kernel(inv_hw, hw, tile, x_ref, w1_ref, b1_ref, w2_ref, b2_ref,
                           att_ref, sum_ref, max_ref):
    t = pl.program_id(1)
    x = x_ref[0]                                                          # (C, tile) native dtype

    if hw % tile != 0:
        # Remainder tile: mask lanes past HW (0 for the sum, dtype-min for the max).
        lane = lax.broadcasted_iota(jnp.int32, x.shape, 1)
        valid = (t * tile + lane) < hw
        x_s = jnp.where(valid, x, jnp.zeros_like(x))
        x_m = jnp.where(valid, x, jnp.full_like(x, jnp.finfo(x.dtype).min))
    else:
        x_s = x
        x_m = x

    part_sum = jnp.sum(x_s, axis=-1, keepdims=True, dtype=jnp.float32)    # (C, 1) f32
    part_max = jnp.max(x_m, axis=-1, keepdims=True).astype(jnp.float32)   # (C, 1) f32

    @pl.when(t == 0)
    def _():
        sum_ref[...] = jnp.zeros_like(sum_ref)
        max_ref[...] = jnp.full_like(max_ref, -jnp.inf)

    sum_ref[...] = sum_ref[...] + part_sum
    max_ref[...] = jnp.maximum(max_ref[...], part_max)

    @pl.when(t == pl.num_programs(1) - 1)
    def _():
        pooled = jnp.concatenate([sum_ref[...] * inv_hw, max_ref[...]], axis=-1)  # (C, 2)
        att_ref[0] = _excite_fused(pooled, w1_ref, b1_ref, w2_ref, b2_ref)        # (C, 1) f32


def _ca_scale_kernel(att_ref, x_ref, out_ref):
    att = att_ref[0].astype(out_ref.dtype)          # (C, 1), cast down once per tile
    out_ref[0] = att * x_ref[0]                     # broadcast multiply in input dtype


def _channel_attention_tiled(x_flat, w1, b1_2d, w2, b2_2d, *, tile1, tile2,
                             budget, donate_x):
    B, C, HW = x_flat.shape
    Cr = w1.shape[0]
    itemsize = x_flat.dtype.itemsize
    n_t1 = pl.cdiv(HW, tile1)
    n_t2 = pl.cdiv(HW, tile2)

    vmem1 = int(min(budget, max(2 * C * tile1 * itemsize + (4 << 20), 32 << 20)))
    vmem2 = int(min(budget, max(4 * C * tile2 * itemsize + (4 << 20), 32 << 20)))

    # Pass 1: per-channel sum/max accumulation over HW tiles + excite + sigmoid.
    pool_kernel = functools.partial(_ca_pool_excite_kernel, 1.0 / HW, HW, tile1)
    att = pl.pallas_call(
        pool_kernel,
        out_shape=jax.ShapeDtypeStruct((B, C, 1), jnp.float32),
        grid_spec=pltpu.PrefetchScalarGridSpec(
            num_scalar_prefetch=0,
            grid=(B, n_t1),
            in_specs=[
                pl.BlockSpec((1, C, tile1), lambda b, t: (b, 0, t)),
                pl.BlockSpec((Cr, C), lambda b, t: (0, 0)),
                pl.BlockSpec((Cr, 1), lambda b, t: (0, 0)),
                pl.BlockSpec((C, Cr), lambda b, t: (0, 0)),
                pl.BlockSpec((C, 1), lambda b, t: (0, 0)),
            ],
            out_specs=pl.BlockSpec((1, C, 1), lambda b, t: (b, 0, 0)),
            scratch_shapes=[
                pltpu.VMEM((C, 1), jnp.float32),   # running sum
                pltpu.VMEM((C, 1), jnp.float32),   # running max
            ],
        ),
        compiler_params=pltpu.CompilerParams(
            dimension_semantics=("parallel", "arbitrary"),
            vmem_limit_bytes=vmem1,
        ),
    )(x_flat, w1, b1_2d, w2, b2_2d)

    # Pass 2: pure streaming scale pass, att * x, both grid axes independent.
    # Default 2-deep buffering with a large lane-dense tile; OOB writes on the
    # remainder tile are dropped by Pallas, so no masking is needed here.
    out = pl.pallas_call(
        _ca_scale_kernel,
        out_shape=jax.ShapeDtypeStruct((B, C, HW), x_flat.dtype),
        grid_spec=pltpu.PrefetchScalarGridSpec(
            num_scalar_prefetch=0,
            grid=(B, n_t2),
            in_specs=[
                pl.BlockSpec((1, C, 1), lambda b, t: (b, 0, 0)),
                pl.BlockSpec((1, C, tile2), lambda b, t: (b, 0, t)),
            ],
            out_specs=pl.BlockSpec((1, C, tile2), lambda b, t: (b, 0, t)),
        ),
        compiler_params=pltpu.CompilerParams(
            dimension_semantics=("parallel", "parallel"),
            vmem_limit_bytes=vmem2,
        ),
        input_output_aliases=({1: 0} if donate_x else {}),
    )(att, x_flat)
    return out


# ----------------------------------------------------------------------------
# Public wrapper.
# ----------------------------------------------------------------------------
def channel_attention(x_nchw, w1, b1, w2, b2, *, force=None, donate_x=False,
                      _tile_override=None):
    """CBAM channel attention. x_nchw: (B, C, H, W) float -> same shape.

    force: None (auto), "single", or "tiled" (testing hook).
    donate_x: alias x's HBM buffer as the output (caller must not reuse x).
    _tile_override: force a specific HW tile on the tiled path (testing hook).
    """
    B, C, H, W = x_nchw.shape
    HW = H * W
    Cr = w1.shape[0]

    x_flat = x_nchw.reshape(B, C, HW)
    b1_2d = b1.reshape(Cr, 1)
    b2_2d = b2.reshape(C, 1)

    budget = _vmem_budget_bytes()
    itemsize = x_flat.dtype.itemsize
    slab_bytes = C * HW * itemsize
    # Single-pass needs ~4x slab (double-buffered in + out) plus headroom.
    single_fits = 4 * slab_bytes + (2 << 20) <= budget

    if force == "single":
        use_single = True
    elif force == "tiled":
        use_single = HW < 128          # tiled path needs >= 128 lanes per tile
    else:
        use_single = single_fits or HW < 128

    if use_single:
        out = _channel_attention_single_pass(
            x_flat, w1, b1_2d, w2, b2_2d, budget=budget, donate_x=donate_x)
    else:
        if _tile_override is not None:
            tile1 = tile2 = int(_tile_override)
        else:
            # Pass 1 holds ~2 tile buffers, pass 2 ~4 -> decoupled tile sizes.
            tile1 = _pick_tile(HW, C, itemsize, (budget - (4 << 20)) // 2)
            tile2 = _pick_tile(HW, C, itemsize, (budget - (4 << 20)) // 4)
        out = _channel_attention_tiled(
            x_flat, w1, b1_2d, w2, b2_2d, tile1=tile1, tile2=tile2,
            budget=budget, donate_x=donate_x)
    return out.reshape(B, C, H, W)


# ----------------------------------------------------------------------------
# Pure-JAX reference matching the PyTorch forward.
# ----------------------------------------------------------------------------
def _reference(x, w1, b1, w2, b2):
    avg = jnp.mean(x, axis=(2, 3))                     # (B, C)
    mx = jnp.max(x, axis=(2, 3))                       # (B, C)

    def excite(v):                                     # (B, C)
        h = jnp.maximum(v @ w1.T + b1, 0.0)            # (B, Cr)
        return h @ w2.T + b2                           # (B, C)

    att = jax.nn.sigmoid(excite(avg) + excite(mx))     # (B, C)
    return att[:, :, None, None] * x


if __name__ == "__main__":
    B, C, H, W = 2, 4, 16, 16
    ratio = 2
    Cr = C // ratio

    key = jax.random.PRNGKey(0)
    kx, kw1, kb1, kw2, kb2 = jax.random.split(key, 5)

    x = jax.random.normal(kx, (B, C, H, W), dtype=jnp.float32)
    # 1x1 conv weights: PyTorch shape (out, in, 1, 1) -> stored here as (out, in).
    w1 = jax.random.normal(kw1, (Cr, C), dtype=jnp.float32) * 0.5
    b1 = jax.random.normal(kb1, (Cr,), dtype=jnp.float32) * 0.1
    w2 = jax.random.normal(kw2, (C, Cr), dtype=jnp.float32) * 0.5
    b2 = jax.random.normal(kb2, (C,), dtype=jnp.float32) * 0.1

    ref = _reference(x, w1, b1, w2, b2)

    # Auto path (small slab -> single-pass).
    out = jax.block_until_ready(channel_attention(x, w1, b1, w2, b2))
    assert out.shape == (B, C, H, W)
    assert jnp.allclose(out, ref, atol=1e-5, rtol=1e-5), "auto/single-pass mismatch"

    # Tiled path, HW divisible by the tile (256 / 128).
    out_tiled = jax.block_until_ready(
        channel_attention(x, w1, b1, w2, b2, force="tiled", _tile_override=128))
    assert jnp.allclose(out_tiled, ref, atol=1e-5, rtol=1e-5), "tiled mismatch"

    # Tiled path with HW NOT divisible by the tile (13*13 = 169 vs tile 128):
    # exercises the cdiv grid + remainder masking.
    B2, C2, H2, W2 = 1, 8, 13, 13
    Cr2 = C2 // ratio
    kx2 = jax.random.PRNGKey(1)
    kw3, kb3, kw4, kb4 = jax.random.split(jax.random.PRNGKey(2), 4)
    x2 = jax.random.normal(kx2, (B2, C2, H2, W2), dtype=jnp.float32)
    w1b = jax.random.normal(kw3, (Cr2, C2), dtype=jnp.float32) * 0.5
    b1b = jax.random.normal(kb3, (Cr2,), dtype=jnp.float32) * 0.1
    w2b = jax.random.normal(kw4, (C2, Cr2), dtype=jnp.float32) * 0.5
    b2b = jax.random.normal(kb4, (C2,), dtype=jnp.float32) * 0.1
    ref2 = _reference(x2, w1b, b1b, w2b, b2b)
    out2 = jax.block_until_ready(
        channel_attention(x2, w1b, b1b, w2b, b2b, force="tiled", _tile_override=128))
    assert jnp.allclose(out2, ref2, atol=1e-5, rtol=1e-5), "masked tiled mismatch"

    print("KERNEL_OK")
</pallas_src>

<mosaic_0001>
module attributes {stable_mosaic.version = 11 : i64} {
  func.func @_ca_single_pass_kernel(%arg0: i32, %arg1: memref<1x4x256xf32, #tpu.memory_space<vmem>>, %arg2: memref<2x4xf32, #tpu.memory_space<vmem>>, %arg3: memref<2x1xf32, #tpu.memory_space<vmem>>, %arg4: memref<4x2xf32, #tpu.memory_space<vmem>>, %arg5: memref<4x1xf32, #tpu.memory_space<vmem>>, %arg6: memref<1x4x256xf32, #tpu.memory_space<vmem>>) attributes {dimension_semantics = [#tpu.dimension_semantics<parallel>], iteration_bounds = array<i64: 2>, scalar_prefetch = 0 : i64, scratch_operands = 0 : i64, tpu.core_type = #tpu.core_type<tc>, window_params = [{transform_indices = @transform_0, window_bounds = array<i64: 1, 4, 256>}, {pipeline_mode = #tpu.pipeline_mode<synchronous>, transform_indices = @transform_1, window_bounds = array<i64: 2, 4>}, {pipeline_mode = #tpu.pipeline_mode<synchronous>, transform_indices = @transform_2, window_bounds = array<i64: 2, 1>}, {pipeline_mode = #tpu.pipeline_mode<synchronous>, transform_indices = @transform_3, window_bounds = array<i64: 4, 2>}, {pipeline_mode = #tpu.pipeline_mode<synchronous>, transform_indices = @transform_4, window_bounds = array<i64: 4, 1>}, {transform_indices = @transform_5, window_bounds = array<i64: 1, 4, 256>}]} {
    %c0 = arith.constant 0 : index
    %c0_0 = arith.constant 0 : index
    %c0_1 = arith.constant 0 : index
    %0 = vector.load %arg1[%c0, %c0_0, %c0_1] : memref<1x4x256xf32, #tpu.memory_space<vmem>>, vector<1x4x256xf32>
    %1 = vector.shape_cast %0 : vector<1x4x256xf32> to vector<4x256xf32>
    %cst = arith.constant dense<0.000000e+00> : vector<4xf32>
    %2 = vector.multi_reduction <add>, %1, %cst [1] : vector<4x256xf32> to vector<4xf32>
    %3 = vector.shape_cast %2 : vector<4xf32> to vector<4x1xf32>
    %cst_2 = arith.constant dense<0xFF800000> : vector<4xf32>
    %4 = vector.multi_reduction <maximumf>, %1, %cst_2 [1] : vector<4x256xf32> to vector<4xf32>
    %5 = vector.shape_cast %4 : vector<4xf32> to vector<4x1xf32>
    %cst_3 = arith.constant 3.906250e-03 : f32
    %6 = vector.broadcast %cst_3 : f32 to vector<4x1xf32>
    %7 = arith.mulf %3, %6 : vector<4x1xf32>
    %8 = tpu.concatenate %7, %5 in 1 : vector<4x1xf32>, vector<4x1xf32> -> vector<4x2xf32>
    %c0_4 = arith.constant 0 : index
    %c0_5 = arith.constant 0 : index
    %9 = vector.load %arg2[%c0_4, %c0_5] : memref<2x4xf32, #tpu.memory_space<vmem>>, vector<2x4xf32>
    %c0_6 = arith.constant 0 : index
    %c0_7 = arith.constant 0 : index
    %10 = vector.load %arg3[%c0_6, %c0_7] : memref<2x1xf32, #tpu.memory_space<vmem>>, vector<2x1xf32>
    %c0_8 = arith.constant 0 : index
    %c0_9 = arith.constant 0 : index
    %11 = vector.load %arg4[%c0_8, %c0_9] : memref<4x2xf32, #tpu.memory_space<vmem>>, vector<4x2xf32>
    %c0_10 = arith.constant 0 : index
    %c0_11 = arith.constant 0 : index
    %12 = vector.load %arg5[%c0_10, %c0_11] : memref<4x1xf32, #tpu.memory_space<vmem>>, vector<4x1xf32>
    %cst_12 = arith.constant dense<0.000000e+00> : vector<2x2xf32>
    %13 = tpu.matmul %9, %8, %cst_12 {dimension_numbers = #tpu.dot_dimension_numbers<[1], [0], [0], [1], [0, 0, 1, 1], [], []>} : vector<2x4xf32>, vector<4x2xf32>, vector<2x2xf32> -> vector<2x2xf32>
    %14 = vector.broadcast %10 : vector<2x1xf32> to vector<2x2xf32>
    %15 = arith.addf %13, %14 : vector<2x2xf32>
    %cst_13 = arith.constant 0.000000e+00 : f32
    %16 = vector.broadcast %cst_13 : f32 to vector<2x2xf32>
    %17 = arith.maximumf %15, %16 : vector<2x2xf32>
    %cst_14 = arith.constant dense<0.000000e+00> : vector<4x2xf32>
    %18 = tpu.matmul %11, %17, %cst_14 {dimension_numbers = #tpu.dot_dimension_numbers<[1], [0], [0], [1], [0, 0, 1, 1], [], []>} : vector<4x2xf32>, vector<2x2xf32>, vector<4x2xf32> -> vector<4x2xf32>
    %19 = vector.broadcast %12 : vector<4x1xf32> to vector<4x2xf32>
    %20 = arith.addf %18, %19 : vector<4x2xf32>
    %21 = vector.extract_strided_slice %20 {offsets = [0, 0], sizes = [4, 1], strides = [1, 1]} : vector<4x2xf32> to vector<4x1xf32>
    %22 = vector.extract_strided_slice %20 {offsets = [0, 1], sizes = [4, 1], strides = [1, 1]} : vector<4x2xf32> to vector<4x1xf32>
    %23 = arith.addf %21, %22 : vector<4x1xf32>
    %24 = arith.negf %23 : vector<4x1xf32>
    %25 = math.exp %24 : vector<4x1xf32>
    %cst_15 = arith.constant 1.000000e+00 : f32
    %26 = vector.broadcast %cst_15 : f32 to vector<4x1xf32>
    %27 = arith.addf %26, %25 : vector<4x1xf32>
    %28 = arith.divf %26, %27 : vector<4x1xf32>
    %29 = vector.broadcast %28 : vector<4x1xf32> to vector<4x256xf32>
    %30 = arith.mulf %29, %1 : vector<4x256xf32>
    %c0_16 = arith.constant 0 : index
    %c0_17 = arith.constant 0 : index
    %c0_18 = arith.constant 0 : index
    %31 = vector.load %arg6[%c0_16, %c0_17, %c0_18] : memref<1x4x256xf32, #tpu.memory_space<vmem>>, vector<1x4x256xf32>
    %32 = vector.shape_cast %31 : vector<1x4x256xf32> to vector<4x256xf32>
    %33 = vector.shape_cast %30 : vector<4x256xf32> to vector<1x4x256xf32>
    tpu.vector_store %arg6[%c0_16, %c0_17, %c0_18], %33 {strides = array<i32>} : memref<1x4x256xf32, #tpu.memory_space<vmem>>, vector<1x4x256xf32>,
    return
  }
  func.func @transform_0(%arg0: i32) -> (i32, i32, i32) {
    %c0_i32 = arith.constant 0 : i32
    %c0_i32_0 = arith.constant 0 : i32
    %c0_i32_1 = arith.constant 0 : i32
    return %arg0, %c0_i32, %c0_i32_0 : i32, i32, i32
  }
  func.func @transform_1(%arg0: i32) -> (i32, i32) {
    %c0_i32 = arith.constant 0 : i32
    %c0_i32_0 = arith.constant 0 : i32
    %c0_i32_1 = arith.constant 0 : i32
    return %c0_i32, %c0_i32_0 : i32, i32
  }
  func.func @transform_2(%arg0: i32) -> (i32, i32) {
    %c0_i32 = arith.constant 0 : i32
    %c0_i32_0 = arith.constant 0 : i32
    %c0_i32_1 = arith.constant 0 : i32
    return %c0_i32, %c0_i32_0 : i32, i32
  }
  func.func @transform_3(%arg0: i32) -> (i32, i32) {
    %c0_i32 = arith.constant 0 : i32
    %c0_i32_0 = arith.constant 0 : i32
    %c0_i32_1 = arith.constant 0 : i32
    return %c0_i32, %c0_i32_0 : i32, i32
  }
  func.func @transform_4(%arg0: i32) -> (i32, i32) {
    %c0_i32 = arith.constant 0 : i32
    %c0_i32_0 = arith.constant 0 : i32
    %c0_i32_1 = arith.constant 0 : i32
    return %c0_i32, %c0_i32_0 : i32, i32
  }
  func.func @transform_5(%arg0: i32) -> (i32, i32, i32) {
    %c0_i32 = arith.constant 0 : i32
    %c0_i32_0 = arith.constant 0 : i32
    %c0_i32_1 = arith.constant 0 : i32
    return %arg0, %c0_i32, %c0_i32_0 : i32, i32, i32
  }
}

</mosaic_0001>

<bundles_post_ra>
// kernel: tpu_custom_call.1
= control target key start
LH: loop header
LB: loop body
LE: loop exit
PB: predicated region body
PF: predicated region fallthrough
CT: control target
= control target key end

     0   :  { %10 = vsyncpa [#allocation3], 0  ;;  %s945_s0 = inlined_call_operand.hbm [shape: f32[2,4,256], index: 0, kind: input, shape index: {}]   ;;  %s946_s1 = inlined_call_operand.vmem [shape: f32[2,4], index: 1, kind: input, shape index: {}]   ;;  %s947_s2 = inlined_call_operand.vmem [shape: f32[2,1], index: 2, kind: input, shape index: {}]   ;;  %s948_s3 = inlined_call_operand.vmem [shape: f32[4,2], index: 3, kind: input, shape index: {}]   ;;  %s949_s4 = inlined_call_operand.vmem [shape: f32[4,1], index: 4, kind: input, shape index: {}]   ;;  %s950_s5 = inlined_call_operand.hbm [shape: f32[2,4,256], index: 5, kind: output, shape index: {}]  }
   0x1   :  { %12 = vsyncpa [#allocation3 + $0x1], 0 }
   0x2   :  { %13 = vsyncpa [#allocation4], 0 }
   0x3   :  { %15 = vsyncpa [#allocation4 + $0x1], 0  ;;  %s763_s18 = smov 0   ;;  %s765_s19 = smov 0  }
   0x4   :  { %s767_s20 = smov 0   ;;  %s769_s21 = smov 0  }
   0x5 LB: > { %s784_s22 = sadd.s32 4294967295, %s725_s21   ;;  %s537_s23 = sadd.s32 4294967294, %s725_s21   ;;  %s725_s21 = sphi %s769_s21, %s965_s21   ;;  %s721_s20 = sphi %s767_s20, %s964_s20   ;;  %s717_s19 = sphi %s765_s19, %s963_s19   ;;  %s713_s18 = sphi %s763_s18, %s962_s18  }
   0x6   : > { %s788_s24 = sadd.s32 1, %s725_s21   ;;  %s28_s25 = sadd.s32 1, %s721_s20 }
   0x7   : > { %s25_s26 = ssub.s32 %s725_s21, %s788_s24  ;;  %p35_p0 = scmp.ne.s32.totalorder %s721_s20, %s717_s19 }
   0x8   : > { %p26_p1 = scmp.eq.s32.totalorder %s25_s26, 0  ;;  %p36_p2 = scmp.eq.s32.totalorder %s725_s21, 0 }
   0x9   : > { %p41_p3 = scmp.ne.s32.totalorder %s717_s19, %s713_s18  ;;  %p42_p4 = scmp.eq.s32.totalorder %s784_s22, 0 }
   0xa   : > { %s800_s27 = scalar_select %p26_p1, %s721_s20, %s28_s25  }
   0xb   : > { %p802_p5 = por %p36_p2, %p35_p0  ;;  %p806_p6 = por %p42_p4, %p41_p3 }
   0xc   : > { %p149_p7 = scmp.eq.s32.totalorder %s784_s22, 1  ;;  %p155_p8 = scmp.eq.s32.totalorder %s537_s23, 1 }
   0xd   : > { %p584_p10 = scmp.lt.s32.totalorder %s725_s21, 2  ;;  %s187_s7 = sand.u32 1, %s721_s20  }
   0xe   : > { %p813_p11 = por %p149_p7, %p35_p0  ;;  %p817_p12 = por %p155_p8, %p41_p3 }
   0xf   : > { %s556_s8 = sshll.u32 %s725_s21, 7  ;;  %s540_s9 = sshll.u32 %s187_s7, 3 }
  0x10   : > { %s954_s30 = scalar_select %p813_p11, 1, 0 }
  0x11   : > { %s955_s6 = scalar_select %p817_p12, 1, 0 }
  0x12   : > { %s826_s12 = scalar_lea.hbm %s945_s0, %s556_s8  ;;  %s191_s13 = scalar_lea.vmem [#allocation2], %s540_s9 }
  0x13   : > { %s199_s14 = sshll.u32 %s191_s13, 4  ;;  %p830_p13 = pnand %p584_p10, %p802_p5  ;;  %s834_s14 = int_to_ptr.vmem [resolvable:$true] %s199_s14 }
  0x14   : > { %s188_s16 = scalar_lea.sflag [#allocation3], %s187_s7  ;;  %s629_s17 = scalar_lea.hbm %s826_s12, 128 }
  0x15   : > { %p630_p2 = scmp.ne.s32.totalorder %s826_s12, %s629_s17  ;;  %p631_p3 = pneg %p830_p13 }
  0x16   : > { %s634_s26 = scalar_lea.hbm %s945_s0, 256  ;;  %p635_p5 = scmp.lt.u32.totalorder %s826_s12, %s945_s0 }
  0x17   : > { %p632_p4 = pnand %p631_p3, %p630_p2  ;;  %p636_p8 = scmp.lt.u32.totalorder %s634_s26, %s629_s17 }
  0x18   : > { %p638_p9 = scmp.lt.u32.totalorder %s629_s17, %s826_s12 }
  0x19   : > { %p633_p7 = pneg %p632_p4  ;;  %p637_p10 = por %p636_p8, %p635_p5 }
  0x1b   : > { %p639_p0 = por %p638_p9, %p637_p10 }
  0x1d   : > { %p640_p1 = pnand %p639_p0, %p633_p7 }
  0x1f   : > { %643 = shalt.err (!%p640_p1)
}
  0x20   : > { %s644_s7 = scalar_lea.vmem %s834_s14, 128  ;;  %s727_s9 = smov [#allocation2]  }
  0x21   : > { %p645_p2 = scmp.ne.s32.totalorder %s834_s14, %s644_s7  ;;  %s649_s10 = sshll.u32 %s727_s9, 4  ;;  %s650_s10 = int_to_ptr.vmem [resolvable:$false] %s649_s10 }
  0x22   : > { %s651_s11 = scalar_lea.vmem %s650_s10, 256  ;;  %p652_p11 = scmp.lt.s32.totalorder %s834_s14, %s650_s10 }
  0x23   : > { %p647_p4 = pnand %p645_p2, %p631_p3  ;;  %p653_p5 = scmp.lt.s32.totalorder %s651_s11, %s644_s7 }
  0x25   : > { %p648_p12 = pneg %p647_p4  ;;  %p654_p8 = por %p653_p5, %p652_p11 }
  0x27   : > { %p655_p9 = pnand %p654_p8, %p648_p12 }
  0x29   : > { %658 = shalt.err (!%p655_p9)
}
  0x2a   : > { %579 = dma.hbm_to_vmem [thread:$0]  (!%p830_p13), %s826_s12, 128, %s834_s14, %s188_s16  }
  0x2b   : > { %p957_p0 = scmp.lt.s32.totalorder %s725_s21, 3  ;;  %p958_p1 = scmp.ge.s32.totalorder %s725_s21, 1 }
  0x2d   : > { %p205_p3 = pnand %p958_p1, %p957_p0 }
  0x2e   : > { %s868_s13 = sand.u32 (!%p205_p3), 1, %s717_s19  }
  0x2f   : > { %208 = sbr.rel (%p205_p3) target bundleno = 929 (0x3a1), region = 40  ;;  %s544_s17 = sshll.u32 (!%p205_p3), %s868_s13, 3 }
  0x30   : > { %s211_s23 = scalar_lea.sflag (!%p205_p3), [#allocation3], %s868_s13  ;;  %s214_s15 = scalar_lea.vmem (!%p205_p3), [#allocation2], %s544_s17 }
  0x36   : > { %704 = dma.done.wait (%p806_p6), %s211_s23, 128  }
  0x37   : > { %706 = vsyncadd (%p806_p6), %s211_s23, 4294967168  ;;  %vm245_vm0 = vcmask 1043456   ;;  %v241_v0 = vld [vmem:[%s214_s15] sm:$0xff]  ;;  %v728_v8 = vmov 0.0   ;;  %vm729_vm1 = vmmov 0   ;;  %v730_v10 = vmov 0  }
  0x38   : > { %v243_v1 = vcombine.high %v241_v0, %v241_v0  ;;  %v246_v2 = vsel %vm245_vm0, %v241_v0, 0.0  ;;  %v251_v4 = vsel %vm245_vm0, %v241_v0, -inf  ;;  %562 = vmatprep.subr.mxu0 %v728_v8  ;;  %567 = vmatprep.subr.mxu1 %v728_v8  ;;  %v260_v9 = vld [vmem:[%s947_s2] sm:$0x3]  ;;  %vm257_vm2 = vcmask 7168   ;;  %s731_s7 = smov 127  }
  0x39   : > { %564 = vmatprep.mubr.msk.f32.mxu0 %vm729_vm1, %v728_v8  ;;  %569 = vmatprep.mubr.msk.f32.mxu1 %vm729_vm1, %v728_v8  ;;  %v262_v11 = vld [vmem:[%s949_s4] sm:$0xf]  ;;  %vm268_vm3 = vcmask 31744   ;;  %vm355_vm4 = vcmask 1041408   ;;  %vm351_vm5 = vcmask 15360   ;;  %s557_s9 = sshll.u32 %s784_s22, 7 }
  0x3a   : > { %v247_v3 = vsel %vm245_vm0, %v243_v1, 0.0  ;;  %v252_v5 = vsel %vm245_vm0, %v243_v1, -inf  ;;  %622 = vset.pattern.permute.xlu1 %v730_v10  ;;  %623 = vset.pattern.permute.xlu0 %v730_v10  ;;  %v259_v15 = vld [vmem:[%s946_s1] sm:$0x3]  ;;  %s240_s10 = scalar_lea.vmem [#allocation5], %s544_s17  ;;  %s901_s29 = scalar_lea.hbm %s950_s5, %s557_s9 }
  0x3b   : > { %v248_v6 = vadd.f32 %v247_v3, %v246_v2  ;;  %v253_v7 = vmax.f32 %v251_v4, %v252_v5  ;;  %265 = vperm.xlu1 %622, %v260_v9   ;;  %v261_v22 = vld [vmem:[%s948_s3] sm:$0xf]  ;;  %s467_s11 = sshll.u32 %s240_s10, 4  ;;  %s453_s12 = scalar_lea.sflag [#allocation4], %s868_s13  ;;  %s903_s11 = int_to_ptr.vmem [resolvable:$true] %s467_s11 }
  0x3c   : > { %s659_s14 = scalar_lea.vmem %s903_s11, 128  ;;  %p959_p11 = scmp.ne.s32.totalorder %s954_s30, 0 }
  0x3d   : > { %249 = vadd.xlane.f32.xlu0 %v248_v6  ;;  %p660_p6 = scmp.ne.s32.totalorder %s903_s11, %s659_s14  ;;  %s732_s22 = smov [#allocation5]  }
  0x3e   : > { %s663_s17 = sshll.u32 %s732_s22, 4  ;;  %s664_s17 = int_to_ptr.vmem [resolvable:$false] %s663_s17 }
  0x3f   : > { %348 = vperm.xlu1 %622, %v262_v11   ;;  %p661_p12 = pnand %p660_p6, %p959_p11  ;;  %s665_s16 = scalar_lea.vmem %s664_s17, 256 }
  0x40   : > { %p666_p7 = scmp.lt.s32.totalorder %s903_s11, %s664_s17  ;;  %p667_p10 = scmp.lt.s32.totalorder %s665_s16, %s659_s14 }
  0x41   : > { %254 = vmax.xlane.f32.xlu0 %v253_v7  ;;  %p662_p13 = pneg %p661_p12 }
  0x42   : > { %p668_p2 = por %p667_p10, %p666_p7 }
  0x44   : > { %p669_p4 = pnand %p668_p2, %p662_p13 }
  0xba   : > { %v266_v17 = vpop.permute.xlu1 %265 }
  0xbe   : > { %v349_v23 = vpop.permute.xlu1 %348 }
  0xca   : > { %v250_v12 = vpop.xlane.xlu0 %249 }
  0xcb   : > { %v256_v13 = vmul.f32 0.00390625, %v250_v12 }
  0xce   : > { %v255_v14 = vpop.xlane.xlu0 %254 }
  0xcf   : > { %v258_v16 = vsel %vm257_vm2, %v256_v13, %v255_v14 }
  0xd0   : > { %563 = vmatpush3.msk.msra.mxu0 %vm245_vm0, %v258_v16 }
  0xd1   : > { %565 = vmatmul.mubr.msk.f32.vlgmr.msra.gmra.mrb[0].mxu0 %vm268_vm3, %v259_v15 }
 0x1a4   : > { %v341_v18 = vpop.f32.mrb[0].mxu0 }
 0x1a5   : > { %v342_v19 = vadd.f32 %v341_v18, %v266_v17  ;;  %v566_v20 = vpop.f32.mrb[1].mxu0 }
 0x1a7   : > { %v345_v21 = vmax.f32 %v342_v19, 0.0 }
 0x1a9   : > { %568 = vmatpush3.msk.msra.mxu1 %vm355_vm4, %v345_v21 }
 0x1aa   : > { %570 = vmatmul.mubr.msk.f32.vlgmr.msra.gmra.mrb[0].mxu1 %vm351_vm5, %v261_v22 }
 0x27d   : > { %v425_v24 = vpop.f32.mrb[0].mxu1 }
 0x27e   : > { %v426_v25 = vadd.f32 %v425_v24, %v349_v23  ;;  %v571_v26 = vpop.f32.mrb[1].mxu1 }
 0x280   : > { %430 = vrot.lane.b32.xlu0 %v426_v25, %s731_s7 }
 0x2f2   : > { %v431_v27 = vpop.permute.xlu0 %430 }
 0x2f3   : > { %v433_v28 = vadd.f32 %v431_v27, %v426_v25 }
 0x2f5   : > { %v550_v29 = vmul.f32 -1.442695, %v433_v28 }
 0x2f7   : > { %625 = vpow2.f32 %v550_v29 }
 0x301   : > { %v626_v30 = vpop.eup %625 }
 0x302   : > { %v437_v31 = vadd.f32 1.0, %v626_v30 }
 0x304   : > { %627 = vrcp.f32 %v437_v31 }
 0x30e   : > { %v628_v32 = vpop.eup %627 }
 0x30f   : > { %442 = vperm.xlu1 %622, %v628_v32  }
 0x38e   : > { %v443_v33 = vpop.permute.xlu1 %442 }
 0x38f   : > { %v445_v34 = vmul.f32 %v443_v33, %v241_v0  ;;  %v446_v35 = vmul.f32 %v443_v33, %v243_v1 }
 0x391   : > { %v449_v36 = vcombine.low %v445_v34, %v446_v35 }
 0x393   : > { %451 = vst [vmem:[%s240_s10] sm:$0xff] %v449_v36 }
 0x394   : > { %672 = shalt.err (!%p669_p4)
}
 0x395   : > { %s673_s13 = scalar_lea.hbm %s901_s29, 128  ;;  %s677_s28 = scalar_lea.hbm %s950_s5, 256 }
 0x396   : > { %p674_p5 = scmp.ne.s32.totalorder %s901_s29, %s673_s13  ;;  %p678_p0 = scmp.lt.u32.totalorder %s901_s29, %s950_s5 }
 0x397   : > { %p679_p1 = scmp.lt.u32.totalorder %s677_s28, %s673_s13  ;;  %p681_p6 = scmp.lt.u32.totalorder %s673_s13, %s901_s29 }
 0x398   : > { %p675_p8 = pnand %p674_p5, %p959_p11 }
 0x399   : > { %p680_p3 = por %p679_p1, %p678_p0 }
 0x39a   : > { %p676_p9 = pneg %p675_p8 }
 0x39b   : > { %p682_p12 = por %p681_p6, %p680_p3 }
 0x39d   : > { %p683_p13 = pnand %p682_p12, %p676_p9 }
 0x39f   : > { %686 = shalt.err (!%p683_p13)
}
 0x3a0   : > { %574 = dma.vmem_to_hbm [thread:$0]  (%p959_p11), %s903_s11, 128, %s901_s29, %s453_s12  }
 0x3a1 PF: > { %s479_s9 = sand.u32 1, %s713_s18   ;;  %p960_p7 = scmp.ne.s32.totalorder %s955_s6, 0 }
 0x3a2   : > { %p961_p10 = scmp.ge.s32.totalorder %s725_s21, 2  ;;  %s480_s10 = scalar_lea.sflag [#allocation4], %s479_s9 }
 0x3a4   : > { %p581_p2 = pnand %p961_p10, %p960_p7 }
 0x3a6   : > { %708 = dma.done.wait (!%p581_p2), %s480_s10, 128  }
 0x3a7   : > { %710 = vsyncadd (!%p581_p2), %s480_s10, 4294967168  ;;  %p18_p4 = scmp.ge.s32.totalorder %s788_s24, 4   ;;  %s962_s18 = smov %s717_s19 }
 0x3a8   : > { %s963_s19 = smov %s721_s20  ;;  %s964_s20 = smov %s800_s27 }
 0x3a9   : > { %s965_s21 = smov %s788_s24  ;;  %20 = sbr.rel (!%p18_p4) target bundleno = 5 (0x5), region = 85 }
 0x3b0   :  { %485 = vsyncpa [#allocation3], 1 }
 0x3b1   :  { %487 = vsyncpa [#allocation3 + $0x1], 1 }
 0x3b2   :  { %488 = vsyncpa [#allocation4], 1 }
 0x3b3   :  { %490 = vsyncpa [#allocation4 + $0x1], 1 }

</bundles_post_ra>
